<compile_context>
chip_gen: v7x
topology: tpu7x:2x2x1
jax: 0.10.0
libtpu: 0.0.40
codegen_flags: <defaults>
</compile_context>

<pallas_src>
import jax
import jax.numpy as jnp
from jax.experimental import pallas as pl
from jax.experimental.pallas import tpu as pltpu


def _fused_kernel(x_ref, wt_ref, b_ref, dinv_k_ref, dinv_i_ref, a_ref,
                  out_ref, acc_ref):
    """One (row-block i, K-block k) step of  out = dinv * (A @ (dinv * (x W + b)))."""
    k = pl.program_id(1)

    @pl.when(k == 0)
    def _():
        acc_ref[...] = jnp.zeros_like(acc_ref)

    # H_k = dinv_k * (x_k @ W_packed + b).  Recomputed per row-block; the extra
    # work is ~c_in/tm of the propagation matmul and hidden under A's DMA.
    h_k = (jnp.dot(x_ref[...], wt_ref[...], preferred_element_type=jnp.float32)
           + b_ref[...]) * dinv_k_ref[...]

    # A is bf16 in HBM/VMEM (exact for small-integer adjacency counts); upcast on
    # the VPU (hidden under the DMA) and accumulate in f32.
    acc_ref[...] += jnp.dot(a_ref[...].astype(jnp.float32), h_k,
                            preferred_element_type=jnp.float32)

    @pl.when(k == pl.num_programs(1) - 1)
    def _():
        out_ref[...] = dinv_i_ref[...] * acc_ref[...]


def _round_up(x, m):
    return (x + m - 1) // m * m


def vgae_encoder(x, edge_index, w_mu, b_mu, w_ls, b_ls, *, tm=None, tk=None):
    """x: [N, Cin] float32, edge_index: [2, E] int32 (row 0 = src, row 1 = dst)."""
    n, c_in = x.shape
    c_out = w_mu.shape[0]
    c2 = 2 * c_out
    c2_pad = _round_up(max(c2, 128), 128)          # lane-dense output slab

    n_pad = _round_up(n, 128)
    if tm is None:
        tm = 256 if n_pad % 256 == 0 else 128
    if tk is None:
        tk = 512 if n_pad % 512 == 0 else (256 if n_pad % 256 == 0 else 128)
    tm = min(tm, n_pad)
    tk = min(tk, n_pad)
    assert n_pad % tm == 0 and n_pad % tk == 0, "tm/tk must divide padded N"

    # --- wrapper glue: single pass over the N^2 adjacency ------------------
    # Dense A[dst, src] += 1 with self-loops, built directly padded & in bf16.
    a = jnp.zeros((n_pad, n_pad), jnp.bfloat16)
    a = a.at[edge_index[1], edge_index[0]].add(jnp.bfloat16(1))
    diag = jnp.arange(n)
    a = a.at[diag, diag].add(jnp.bfloat16(1))

    # Degrees from the edge list (+1 self loop) -- no N^2 reduction pass.
    deg = jnp.ones((n,), jnp.float32).at[edge_index[1]].add(1.0)
    dinv = jax.lax.rsqrt(deg).reshape(n, 1)
    dinv_p = jnp.pad(dinv, ((0, n_pad - n), (0, 0)))   # zero on pad rows

    x_p = jnp.pad(x.astype(jnp.float32), ((0, n_pad - n), (0, 0)))

    # Packed, pre-transposed, lane-padded weights: [Cin, c2_pad]; bias [1, c2_pad].
    wt = jnp.concatenate([w_mu, w_ls], axis=0).T.astype(jnp.float32)
    wt = jnp.pad(wt, ((0, 0), (0, c2_pad - c2)))
    b = jnp.concatenate([b_mu, b_ls], axis=0).reshape(1, c2).astype(jnp.float32)
    b = jnp.pad(b, ((0, 0), (0, c2_pad - c2)))

    grid = (n_pad // tm, n_pad // tk)

    # VMEM budget: double-buffered blocks + resident weights + accumulator.
    vmem_est = (2 * tm * tk * 2                  # A blocks (bf16)
                + 2 * tk * max(c_in, 128) * 4    # x blocks
                + 2 * (tm + tk) * 128 * 4        # dinv blocks (lane padded)
                + 2 * c_in * c2_pad * 4          # resident packed weights
                + 3 * tm * c2_pad * 4)           # out blocks + accumulator
    vmem_limit = int(min(max(2 * vmem_est, 16 << 20), 48 << 20))

    out = pl.pallas_call(
        _fused_kernel,
        out_shape=jax.ShapeDtypeStruct((n_pad, c2_pad), jnp.float32),
        grid_spec=pltpu.PrefetchScalarGridSpec(
            num_scalar_prefetch=0,
            grid=grid,
            in_specs=[
                pl.BlockSpec((tk, c_in), lambda i, k: (k, 0)),       # x K-block
                pl.BlockSpec((c_in, c2_pad), lambda i, k: (0, 0)),   # packed W^T (resident)
                pl.BlockSpec((1, c2_pad), lambda i, k: (0, 0)),      # packed bias (resident)
                pl.BlockSpec((tk, 1), lambda i, k: (k, 0)),          # dinv (column scale)
                pl.BlockSpec((tm, 1), lambda i, k: (i, 0)),          # dinv (row scale)
                pl.BlockSpec((tm, tk), lambda i, k: (i, k)),         # A block (bf16)
            ],
            out_specs=pl.BlockSpec((tm, c2_pad), lambda i, k: (i, 0)),
            scratch_shapes=[pltpu.VMEM((tm, c2_pad), jnp.float32)],
        ),
        compiler_params=pltpu.CompilerParams(
            dimension_semantics=("parallel", "arbitrary"),
            vmem_limit_bytes=vmem_limit,
        ),
    )(x_p, wt, b, dinv_p, dinv_p, a)

    out = out[:n]
    mu = out[:, :c_out]
    logstd = out[:, c_out:c2]
    zeta = mu                      # eval-mode reparameterization returns mu (aliased)
    return mu, logstd, zeta


def _reference(x, edge_index, w_mu, b_mu, w_ls, b_ls):
    """Pure-JAX reference for correctness checking."""
    n = x.shape[0]
    a = jnp.zeros((n, n), jnp.float32)
    a = a.at[edge_index[1], edge_index[0]].add(1.0)
    diag = jnp.arange(n)
    a = a.at[diag, diag].add(1.0)
    deg = a.sum(axis=1)
    dinv = 1.0 / jnp.sqrt(deg)
    a_norm = a * dinv[:, None] * dinv[None, :]
    mu = a_norm @ (x @ w_mu.T + b_mu)
    logstd = a_norm @ (x @ w_ls.T + b_ls)
    return mu, logstd, mu


if __name__ == "__main__":
    key = jax.random.PRNGKey(0)
    kx, kw1, kb1, kw2, kb2 = jax.random.split(key, 5)

    N, C_IN, C_OUT = 200, 32, 16

    x = jax.random.normal(kx, (N, C_IN), jnp.float32)

    # Deterministic parameter init (shapes follow torch.nn.Linear(in, out)).
    w_mu = jax.random.normal(kw1, (C_OUT, C_IN), jnp.float32) * 0.1
    b_mu = jax.random.normal(kb1, (C_OUT,), jnp.float32) * 0.1
    w_ls = jax.random.normal(kw2, (C_OUT, C_IN), jnp.float32) * 0.1
    b_ls = jax.random.normal(kb2, (C_OUT,), jnp.float32) * 0.1

    # Undirected ring graph as edge_index [2, E] (both directions included).
    src = jnp.arange(N, dtype=jnp.int32)
    dst = (src + 1) % N
    edge_index = jnp.stack([jnp.concatenate([src, dst]),
                            jnp.concatenate([dst, src])])

    # tm=tk=128 with n_pad=256 -> 2x2 grid: exercises the parallel row axis,
    # the K-accumulation path and the N -> n_pad padding.
    mu, logstd, zeta = vgae_encoder(x, edge_index, w_mu, b_mu, w_ls, b_ls,
                                    tm=128, tk=128)
    jax.block_until_ready((mu, logstd, zeta))

    mu_r, ls_r, zeta_r = _reference(x, edge_index, w_mu, b_mu, w_ls, b_ls)
    assert jnp.allclose(mu, mu_r, atol=1e-4, rtol=1e-4)
    assert jnp.allclose(logstd, ls_r, atol=1e-4, rtol=1e-4)
    assert jnp.allclose(zeta, zeta_r, atol=1e-4, rtol=1e-4)

    print("KERNEL_OK")
</pallas_src>

<mosaic_0001>
module attributes {stable_mosaic.version = 11 : i64} {
  func.func @_fused_kernel(%arg0: i32, %arg1: i32, %arg2: memref<128x32xf32, #tpu.memory_space<vmem>>, %arg3: memref<32x128xf32, #tpu.memory_space<vmem>>, %arg4: memref<1x128xf32, #tpu.memory_space<vmem>>, %arg5: memref<128x1xf32, #tpu.memory_space<vmem>>, %arg6: memref<128x1xf32, #tpu.memory_space<vmem>>, %arg7: memref<128x128xbf16, #tpu.memory_space<vmem>>, %arg8: memref<128x128xf32, #tpu.memory_space<vmem>>, %arg9: memref<128x128xf32, #tpu.memory_space<vmem>>) attributes {dimension_semantics = [#tpu.dimension_semantics<parallel>, #tpu.dimension_semantics<arbitrary>], iteration_bounds = array<i64: 2, 2>, scalar_prefetch = 0 : i64, scratch_operands = 1 : i64, tpu.core_type = #tpu.core_type<tc>, window_params = [{transform_indices = @transform_0, window_bounds = array<i64: 128, 32>}, {pipeline_mode = #tpu.pipeline_mode<synchronous>, transform_indices = @transform_1, window_bounds = array<i64: 32, 128>}, {pipeline_mode = #tpu.pipeline_mode<synchronous>, transform_indices = @transform_2, window_bounds = array<i64: 1, 128>}, {transform_indices = @transform_3, window_bounds = array<i64: 128, 1>}, {transform_indices = @transform_4, window_bounds = array<i64: 128, 1>}, {transform_indices = @transform_5, window_bounds = array<i64: 128, 128>}, {transform_indices = @transform_6, window_bounds = array<i64: 128, 128>}]} {
    %c0_i32 = arith.constant 0 : i32
    %0 = arith.cmpi eq, %arg1, %c0_i32 : i32
    %1 = arith.extui %0 : i1 to i32
    %c0_i32_0 = arith.constant 0 : i32
    %2 = arith.cmpi ne, %1, %c0_i32_0 : i32
    scf.if %2 {
      %cst_16 = arith.constant 0.000000e+00 : f32
      %21 = vector.broadcast %cst_16 : f32 to vector<128x128xf32>
      %c0_17 = arith.constant 0 : index
      %c0_18 = arith.constant 0 : index
      %22 = vector.load %arg9[%c0_17, %c0_18] : memref<128x128xf32, #tpu.memory_space<vmem>>, vector<128x128xf32>
      tpu.vector_store %arg9[%c0_17, %c0_18], %21 {strides = array<i32>} : memref<128x128xf32, #tpu.memory_space<vmem>>, vector<128x128xf32>,
    } else {
    }
    %c0 = arith.constant 0 : index
    %c0_1 = arith.constant 0 : index
    %3 = vector.load %arg2[%c0, %c0_1] : memref<128x32xf32, #tpu.memory_space<vmem>>, vector<128x32xf32>
    %c0_2 = arith.constant 0 : index
    %c0_3 = arith.constant 0 : index
    %4 = vector.load %arg3[%c0_2, %c0_3] : memref<32x128xf32, #tpu.memory_space<vmem>>, vector<32x128xf32>
    %cst = arith.constant dense<0.000000e+00> : vector<128x128xf32>
    %5 = tpu.matmul %3, %4, %cst {dimension_numbers = #tpu.dot_dimension_numbers<[1], [0], [0], [1], [0, 0, 1, 1], [], []>} : vector<128x32xf32>, vector<32x128xf32>, vector<128x128xf32> -> vector<128x128xf32>
    %c0_4 = arith.constant 0 : index
    %c0_5 = arith.constant 0 : index
    %6 = vector.load %arg4[%c0_4, %c0_5] : memref<1x128xf32, #tpu.memory_space<vmem>>, vector<1x128xf32>
    %7 = vector.broadcast %6 : vector<1x128xf32> to vector<128x128xf32>
    %8 = arith.addf %5, %7 : vector<128x128xf32>
    %c0_6 = arith.constant 0 : index
    %c0_7 = arith.constant 0 : index
    %9 = vector.load %arg5[%c0_6, %c0_7] : memref<128x1xf32, #tpu.memory_space<vmem>>, vector<128x1xf32>
    %10 = vector.broadcast %9 : vector<128x1xf32> to vector<128x128xf32>
    %11 = arith.mulf %8, %10 : vector<128x128xf32>
    %c0_8 = arith.constant 0 : index
    %c0_9 = arith.constant 0 : index
    %12 = vector.load %arg9[%c0_8, %c0_9] : memref<128x128xf32, #tpu.memory_space<vmem>>, vector<128x128xf32>
    %c0_10 = arith.constant 0 : index
    %c0_11 = arith.constant 0 : index
    %13 = vector.load %arg7[%c0_10, %c0_11] : memref<128x128xbf16, #tpu.memory_space<vmem>>, vector<128x128xbf16>
    %14 = arith.extf %13 : vector<128x128xbf16> to vector<128x128xf32>
    %cst_12 = arith.constant dense<0.000000e+00> : vector<128x128xf32>
    %15 = tpu.matmul %14, %11, %cst_12 {dimension_numbers = #tpu.dot_dimension_numbers<[1], [0], [0], [1], [0, 0, 1, 1], [], []>} : vector<128x128xf32>, vector<128x128xf32>, vector<128x128xf32> -> vector<128x128xf32>
    %16 = arith.addf %12, %15 : vector<128x128xf32>
    %c0_13 = arith.constant 0 : index
    %c0_14 = arith.constant 0 : index
    %17 = vector.load %arg9[%c0_13, %c0_14] : memref<128x128xf32, #tpu.memory_space<vmem>>, vector<128x128xf32>
    tpu.vector_store %arg9[%c0_13, %c0_14], %16 {strides = array<i32>} : memref<128x128xf32, #tpu.memory_space<vmem>>, vector<128x128xf32>,
    %c1_i32 = arith.constant 1 : i32
    %18 = arith.cmpi eq, %arg1, %c1_i32 : i32
    %19 = arith.extui %18 : i1 to i32
    %c0_i32_15 = arith.constant 0 : i32
    %20 = arith.cmpi ne, %19, %c0_i32_15 : i32
    scf.if %20 {
      %c0_16 = arith.constant 0 : index
      %c0_17 = arith.constant 0 : index
      %21 = vector.load %arg6[%c0_16, %c0_17] : memref<128x1xf32, #tpu.memory_space<vmem>>, vector<128x1xf32>
      %c0_18 = arith.constant 0 : index
      %c0_19 = arith.constant 0 : index
      %22 = vector.load %arg9[%c0_18, %c0_19] : memref<128x128xf32, #tpu.memory_space<vmem>>, vector<128x128xf32>
      %23 = vector.broadcast %21 : vector<128x1xf32> to vector<128x128xf32>
      %24 = arith.mulf %23, %22 : vector<128x128xf32>
      %c0_20 = arith.constant 0 : index
      %c0_21 = arith.constant 0 : index
      %25 = vector.load %arg8[%c0_20, %c0_21] : memref<128x128xf32, #tpu.memory_space<vmem>>, vector<128x128xf32>
      tpu.vector_store %arg8[%c0_20, %c0_21], %24 {strides = array<i32>} : memref<128x128xf32, #tpu.memory_space<vmem>>, vector<128x128xf32>,
    } else {
    }
    return
  }
  func.func @transform_0(%arg0: i32, %arg1: i32) -> (i32, i32) {
    %c0_i32 = arith.constant 0 : i32
    %c0_i32_0 = arith.constant 0 : i32
    return %arg1, %c0_i32 : i32, i32
  }
  func.func @transform_1(%arg0: i32, %arg1: i32) -> (i32, i32) {
    %c0_i32 = arith.constant 0 : i32
    %c0_i32_0 = arith.constant 0 : i32
    %c0_i32_1 = arith.constant 0 : i32
    return %c0_i32, %c0_i32_0 : i32, i32
  }
  func.func @transform_2(%arg0: i32, %arg1: i32) -> (i32, i32) {
    %c0_i32 = arith.constant 0 : i32
    %c0_i32_0 = arith.constant 0 : i32
    %c0_i32_1 = arith.constant 0 : i32
    return %c0_i32, %c0_i32_0 : i32, i32
  }
  func.func @transform_3(%arg0: i32, %arg1: i32) -> (i32, i32) {
    %c0_i32 = arith.constant 0 : i32
    %c0_i32_0 = arith.constant 0 : i32
    return %arg1, %c0_i32 : i32, i32
  }
  func.func @transform_4(%arg0: i32, %arg1: i32) -> (i32, i32) {
    %c0_i32 = arith.constant 0 : i32
    %c0_i32_0 = arith.constant 0 : i32
    return %arg0, %c0_i32 : i32, i32
  }
  func.func @transform_5(%arg0: i32, %arg1: i32) -> (i32, i32) {
    %c0_i32 = arith.constant 0 : i32
    return %arg0, %arg1 : i32, i32
  }
  func.func @transform_6(%arg0: i32, %arg1: i32) -> (i32, i32) {
    %c0_i32 = arith.constant 0 : i32
    %c0_i32_0 = arith.constant 0 : i32
    return %arg0, %c0_i32 : i32, i32
  }
}

</mosaic_0001>

<bundles_post_ra>
// kernel: tpu_custom_call.1
= control target key start
LH: loop header
LB: loop body
LE: loop exit
PB: predicated region body
PF: predicated region fallthrough
CT: control target
= control target key end

     0   :  { %s2164_s0 = inlined_call_operand.vmem [shape: f32[256,32], index: 0, kind: input, shape index: {}]   ;;  %s2165_s1 = inlined_call_operand.vmem [shape: f32[32,128], index: 1, kind: input, shape index: {}]   ;;  %s2166_s2 = inlined_call_operand.vmem [shape: f32[1,128], index: 2, kind: input, shape index: {}]   ;;  %s2167_s3 = inlined_call_operand.vmem [shape: f32[256,1], index: 3, kind: input, shape index: {}]   ;;  %s2168_s4 = inlined_call_operand.vmem [shape: f32[256,1], index: 4, kind: input, shape index: {}]   ;;  %s2169_s5 = inlined_call_operand.vmem [shape: bf16[256,256], index: 5, kind: input, shape index: {}]   ;;  %s2170_s6 = inlined_call_operand.hbm [shape: f32[256,128], index: 6, kind: output, shape index: {}]  }
   0x1   :  { %2177 = sst [smem:[#allocation14_spill]] %s2169_s5 }
   0x2   :  { %11 = vsyncpa [#allocation5], 0 }
   0x3   :  { %13 = vsyncpa [#allocation5 + $0x1], 0  ;;  %s1820_s21 = smov 0   ;;  %s1822_s22 = smov 0  }
   0x4   :  { %s1824_s23 = smov 0   ;;  %s1826_s24 = smov 0  }
   0x5   :  { %s1828_s25 = smov 0   ;;  %s1830_s26 = smov 0  }
   0x6   :  { %s1832_s27 = smov 0   ;;  %s1834_s28 = smov 0  }
   0x7   :  { %s1836_s29 = smov 0   ;;  %s1838_s30 = smov 0  }
   0x8 LB: > { %2178 = sst [smem:[#allocation7_spill]] %s1757_s25  ;;  %s1293_s7 = sadd.s32 4294967295, %s1777_s30   ;;  %s1777_s30 = sphi %s1838_s30, %s19_s30   ;;  %s1773_s29 = sphi %s1836_s29, %s2196_s29   ;;  %s1769_s28 = sphi %s1834_s28, %s2195_s28   ;;  %s1765_s27 = sphi %s1832_s27, %s2194_s27   ;;  %s1761_s26 = sphi %s1830_s26, %s2193_s26   ;;  %s1757_s25 = sphi %s1828_s25, %s2192_s25   ;;  %s1753_s24 = sphi %s1826_s24, %s2191_s24   ;;  %s1749_s23 = sphi %s1824_s23, %s2199_s23   ;;  %s1745_s22 = sphi %s1822_s22, %s2198_s22   ;;  %s1741_s21 = sphi %s1820_s21, %s2197_s21  }
   0x9   : > { %2179 = sst [smem:[#allocation8_spill]] %s1769_s28  ;;  %s1294_s8 = sadd.s32 4294967294, %s1777_s30  }
   0xa   : > { %2180 = sst [smem:[#allocation9_spill]] %s1773_s29  ;;  %s28_s9 = sadd.s32 1, %s1769_s28 }
   0xb   : > { %s31_s10 = sadd.s32 1, %s1773_s29  ;;  %p29_p0 = scmp.ge.s32.totalorder %s28_s9, 2 }
   0xc   : > { %s160_s11 = sadd.s32 1, %s1757_s25  ;;  %p167_p1 = scmp.ne.s32.totalorder %s1757_s25, %s1753_s24 }
   0xd   : > { %p168_p2 = scmp.eq.s32.totalorder %s1777_s30, 0  ;;  %s2201_s9 = smov (%p29_p0, %s28_s9), 0 }
   0xe   : > { %2181 = sst [smem:[#allocation10_spill]] %s2201_s9  ;;  %s2203_s10 = smov (!%p29_p0, %s31_s10), %s1773_s29 }
   0xf   : > { %s156_s12 = ssub.s32 %s1769_s28, %s2201_s9  ;;  %p1883_p3 = por %p168_p2, %p167_p1 }
  0x10   : > { %p33_p4 = scmp.ge.s32.totalorder %s2203_s10, 2  ;;  %s186_s14 = sadd.s32 1, %s1749_s23 }
  0x11   : > { %p196_p5 = scmp.ne.s32.totalorder %s1749_s23, %s1745_s22  ;;  %p197_p6 = scmp.eq.s32.totalorder %s1293_s7, 3 }
  0x12   : > { %s2205_s10 = smov (%p33_p4, %s2203_s10), 0  ;;  %p202_p8 = scmp.ne.s32.totalorder %s1745_s22, %s1741_s21 }
  0x13   : > { %2183 = sst [smem:[#allocation11_spill]] %s2205_s10  ;;  %p1892_p7 = por %p197_p6, %p196_p5 }
  0x14   : > { %s155_s16 = ssub.s32 %s1773_s29, %s2205_s10  ;;  %p203_p9 = scmp.eq.s32.totalorder %s1294_s8, 3 }
  0x15   : > { %s157_s17 = sor.u32 %s156_s12, %s155_s16  ;;  %p184_p10 = scmp.eq.s32.totalorder %s155_s16, 0 }
  0x16   : > { %p158_p11 = scmp.eq.s32.totalorder %s157_s17, 0  ;;  %p1900_p12 = por %p203_p9, %p202_p8 }
  0x17   : > { %s1905_s19 = scalar_select %p184_p10, %s1749_s23, %s186_s14  }
  0x18   : > { %s1908_s20 = scalar_select %p158_p11, %s1757_s25, %s160_s11  }
  0x19   : > { %2186 = sst [smem:[#allocation12_spill]] %s1905_s19  ;;  %p1296_p13 = scmp.ge.s32.totalorder %s1777_s30, 4 }
  0x1a   : > { %2187 = sst [smem:[#allocation13_spill]] %s1908_s20 }
  0x1b   : > { %225 = sbr.rel (%p1296_p13) target bundleno = 54 (0x36), region = 24 }
  0x22   : > { %255 = sbr.rel (!%p1883_p3) target bundleno = 54 (0x36), region = 40  ;;  %s257_s7 = sand.u32 (%p1883_p3), 1, %s1757_s25  }
  0x23   : > { %s1334_s8 = sshll.u32 (%p1883_p3), %s1773_s29, 5  ;;  %s1297_s12 = sshll.u32 (%p1883_p3), %s257_s7, 6 }
  0x24   : > { %s262_s16 = sadd.s32 (%p1883_p3), %s1769_s28, %s1334_s8  ;;  %s2188_s5 = sld [smem:[#allocation14_spill]] (%p1883_p3) }
  0x25   : > { %s1300_s17 = sshll.u32 (%p1883_p3), %s262_s16, 2  ;;  %s259_s11 = scalar_lea.vmem (%p1883_p3), [#allocation3], %s1297_s12 }
  0x2a   : > { %s1919_s14 = scalar_lea.vmem %s2188_s5, %s1300_s17 }
  0x2b   : > { %v280_v0 = vld [vmem:[%s1919_s14] sm:$0xf]  ;;  %v282_v1 = vld [vmem:[%s1919_s14 + $0x8] sm:$0xf]  ;;  %v284_v2 = vld [vmem:[%s1919_s14 + $0x10] sm:$0xf] }
  0x2c   : > { %281 = vst [vmem:[%s259_s11] sm:$0xf] %v280_v0  ;;  %283 = vst [vmem:[%s259_s11 + $0x4] sm:$0xf] %v282_v1  ;;  %v286_v3 = vld [vmem:[%s1919_s14 + $0x18] sm:$0xf] }
  0x2d   : > { %285 = vst [vmem:[%s259_s11 + $0x8] sm:$0xf] %v284_v2  ;;  %v288_v4 = vld [vmem:[%s1919_s14 + $0x20] sm:$0xf]  ;;  %v290_v5 = vld [vmem:[%s1919_s14 + $0x28] sm:$0xf] }
  0x2e   : > { %287 = vst [vmem:[%s259_s11 + $0xc] sm:$0xf] %v286_v3  ;;  %289 = vst [vmem:[%s259_s11 + $0x10] sm:$0xf] %v288_v4  ;;  %v292_v6 = vld [vmem:[%s1919_s14 + $0x30] sm:$0xf] }
  0x2f   : > { %291 = vst [vmem:[%s259_s11 + $0x14] sm:$0xf] %v290_v5  ;;  %v294_v7 = vld [vmem:[%s1919_s14 + $0x38] sm:$0xf]  ;;  %v296_v8 = vld [vmem:[%s1919_s14 + $0x40] sm:$0xf] }
  0x30   : > { %293 = vst [vmem:[%s259_s11 + $0x18] sm:$0xf] %v292_v6  ;;  %295 = vst [vmem:[%s259_s11 + $0x1c] sm:$0xf] %v294_v7  ;;  %v298_v9 = vld [vmem:[%s1919_s14 + $0x48] sm:$0xf] }
  0x31   : > { %297 = vst [vmem:[%s259_s11 + $0x20] sm:$0xf] %v296_v8  ;;  %v300_v10 = vld [vmem:[%s1919_s14 + $0x50] sm:$0xf]  ;;  %v302_v11 = vld [vmem:[%s1919_s14 + $0x58] sm:$0xf] }
  0x32   : > { %299 = vst [vmem:[%s259_s11 + $0x24] sm:$0xf] %v298_v9  ;;  %301 = vst [vmem:[%s259_s11 + $0x28] sm:$0xf] %v300_v10  ;;  %v304_v12 = vld [vmem:[%s1919_s14 + $0x60] sm:$0xf] }
  0x33   : > { %303 = vst [vmem:[%s259_s11 + $0x2c] sm:$0xf] %v302_v11  ;;  %v306_v13 = vld [vmem:[%s1919_s14 + $0x68] sm:$0xf]  ;;  %v308_v14 = vld [vmem:[%s1919_s14 + $0x70] sm:$0xf] }
  0x34   : > { %305 = vst [vmem:[%s259_s11 + $0x30] sm:$0xf] %v304_v12  ;;  %307 = vst [vmem:[%s259_s11 + $0x34] sm:$0xf] %v306_v13  ;;  %v310_v15 = vld [vmem:[%s1919_s14 + $0x78] sm:$0xf] }
  0x35   : > { %309 = vst [vmem:[%s259_s11 + $0x38] sm:$0xf] %v308_v14  ;;  %311 = vst [vmem:[%s259_s11 + $0x3c] sm:$0xf] %v310_v15 }
  0x36 PF: > { %p1301_p0 = scmp.ge.s32.totalorder %s1777_s30, 1  ;;  %p365_p1 = scmp.lt.s32.totalorder %s1777_s30, 5 }
  0x38   : > { %p366_p2 = pnand %p1301_p0, %p365_p1 }
  0x39   : > { %s372_s9 = sand.u32 (!%p366_p2), 1, %s1753_s24   ;;  %s2175_s10 = sand.u32 (!%p366_p2), 1, %s1745_s22  }
  0x3a   : > { %369 = sbr.rel (%p366_p2) target bundleno = 707 (0x2c3), region = 81  ;;  %s1302_s13 = sshll.u32 (!%p366_p2), %s372_s9, 6 }
  0x3b   : > { %s1303_s7 = sshll.u32 (!%p366_p2), %s2175_s10, 7  ;;  %s1304_s8 = sshll.u32 (!%p366_p2), %s1761_s26, 4 }
  0x3c   : > { %s1308_s12 = sshll.u32 (!%p366_p2), %s1765_s27, 4  ;;  %p417_p3 = scmp.lt.s32.totalorder (!%p366_p2), %s1304_s8, 31 }
  0x3d   : > { %p429_p4 = scmp.lt.s32.totalorder (!%p366_p2), %s1308_s12, 31  ;;  %s1960_s25 = scalar_lea.vmem (!%p366_p2), [#allocation3], %s1302_s13 }
  0x3e   : > { %s1962_s19 = scalar_lea.vmem (!%p366_p2), [#allocation4], %s1303_s7  ;;  %p1310_p5 = scmp.ne.s32.totalorder (!%p366_p2), %s1761_s26, 0 }
  0x41   : > { %s2207_s8 = smov (!%p417_p3, %s1304_s8), 31  ;;  %s2209_s12 = smov (!%p429_p4, %s1308_s12), 31 }
  0x42   : > { %s1305_s16 = sshll.u32 %s2207_s8, 3  ;;  %s1309_s9 = sshll.u32 %s2209_s12, 3  ;;  %v1779_v16 = vmov (!%p1310_p5), 0.0  }
  0x43   : > { %s1948_s11 = scalar_lea.vmem %s2164_s0, %s1305_s16  ;;  %s1953_s24 = scalar_lea.vmem %s2167_s3, %s1305_s16  ;;  %440 = vst [vmem:[#allocation2] sm:$0xff] (!%p1310_p5), %v1779_v16  ;;  %441 = vst [vmem:[#allocation2 + $0x8] sm:$0xff] (!%p1310_p5), %v1779_v16 }
  0x44   : > { %s1958_s20 = scalar_lea.vmem %s2168_s4, %s1309_s9  ;;  %439 = sbr.rel (%p1310_p5) target bundleno = 75 (0x4b), region = 89  ;;  %442 = vst [vmem:[#allocation2 + $0x10] sm:$0xff] (!%p1310_p5), %v1779_v16  ;;  %443 = vst [vmem:[#allocation2 + $0x18] sm:$0xff] (!%p1310_p5), %v1779_v16 }
  0x45   : > { %444 = vst [vmem:[#allocation2 + $0x20] sm:$0xff] (!%p1310_p5), %v1779_v16  ;;  %445 = vst [vmem:[#allocation2 + $0x28] sm:$0xff] (!%p1310_p5), %v1779_v16 }
  0x46   : > { %446 = vst [vmem:[#allocation2 + $0x30] sm:$0xff] (!%p1310_p5), %v1779_v16  ;;  %447 = vst [vmem:[#allocation2 + $0x38] sm:$0xff] (!%p1310_p5), %v1779_v16 }
  0x47   : > { %448 = vst [vmem:[#allocation2 + $0x40] sm:$0xff] (!%p1310_p5), %v1779_v16  ;;  %449 = vst [vmem:[#allocation2 + $0x48] sm:$0xff] (!%p1310_p5), %v1779_v16 }
  0x48   : > { %450 = vst [vmem:[#allocation2 + $0x50] sm:$0xff] (!%p1310_p5), %v1779_v16  ;;  %451 = vst [vmem:[#allocation2 + $0x58] sm:$0xff] (!%p1310_p5), %v1779_v16 }
  0x49   : > { %452 = vst [vmem:[#allocation2 + $0x60] sm:$0xff] (!%p1310_p5), %v1779_v16  ;;  %453 = vst [vmem:[#allocation2 + $0x68] sm:$0xff] (!%p1310_p5), %v1779_v16 }
  0x4a   : > { %454 = vst [vmem:[#allocation2 + $0x70] sm:$0xff] (!%p1310_p5), %v1779_v16  ;;  %455 = vst [vmem:[#allocation2 + $0x78] sm:$0xff] (!%p1310_p5), %v1779_v16 }
  0x4b PF: > { %v472_v17 = vld [vmem:[%s2165_s1] sm:$0xff]  ;;  %v473_v18 = vld [vmem:[%s2165_s1 + $0x8] sm:$0xff]  ;;  %v474_v19 = vld [vmem:[%s2165_s1 + $0x10] sm:$0xff]  ;;  %vm483_vm0 = vcmask 261120   ;;  %v1780_v23 = vmov 0   ;;  %p1328_p6 = scmp.ne.s32.totalorder %s1761_s26, 1 }
  0x4c   : > { %v1515_v20 = vpack.c.bf16 %v473_v18, %v472_v17  ;;  %v475_v21 = vld [vmem:[%s2165_s1 + $0x18] sm:$0xff]  ;;  %v456_v22 = vld [vmem:[%s1948_s11] sm:$0xff]  ;;  %1663 = vset.pattern.permute.xlu0 %v1780_v23  ;;  %1664 = vset.pattern.permute.xlu1 %v1780_v23  ;;  %v679_v26 = vld [vmem:[%s1953_s24 + $0x10] sm:$0xff] }
  0x4d   : > { %v1519_v24 = vpack.c.bf16 %v475_v21, %v474_v19  ;;  %1435 = vmatprep.mubr.msk.f32.mxu0 %vm483_vm0, %v456_v22  ;;  %v677_v25 = vld [vmem:[%s1953_s24] sm:$0xff]  ;;  %v457_v27 = vld [vmem:[%s1948_s11 + $0x8] sm:$0xff]  ;;  %705 = vperm.xlu1 %1664, %v679_v26   ;;  %v458_v29 = vld [vmem:[%s1948_s11 + $0x10] sm:$0xff] }
  0x4e   : > { %1516 = vmatprep.subr.bf16.mxu0 %v1515_v20  ;;  %695 = vperm.xlu0 %1663, %v677_v25   ;;  %v678_v28 = vld [vmem:[%s1953_s24 + $0x8] sm:$0xff]  ;;  %v680_v30 = vld [vmem:[%s1953_s24 + $0x18] sm:$0xff]  ;;  %v681_v32 = vld [vmem:[%s1953_s24 + $0x20] sm:$0xff] }
  0x4f   : > { %1518 = vmatpush3.bf16.msra.mxu0 %v1515_v20  ;;  %v459_v31 = vld [vmem:[%s1948_s11 + $0x18] sm:$0xff]  ;;  %v460_v33 = vld [vmem:[%s1948_s11 + $0x20] sm:$0xff]  ;;  %v682_v34 = vld [vmem:[%s1953_s24 + $0x28] sm:$0xff] }
  0x50   : > { %1520 = vmatprep.subr.bf16.mxu0 %v1519_v24  ;;  %v461_v35 = vld [vmem:[%s1948_s11 + $0x28] sm:$0xff]  ;;  %v683_v36 = vld [vmem:[%s1953_s24 + $0x30] sm:$0xff]  ;;  %v684_v38 = vld [vmem:[%s1953_s24 + $0x38] sm:$0xff] }
  0x51   : > { %710 = vperm.xlu1 %1664, %v680_v30   ;;  %v462_v37 = vld [vmem:[%s1948_s11 + $0x30] sm:$0xff]  ;;  %v463_v39 = vld [vmem:[%s1948_s11 + $0x38] sm:$0xff]  ;;  %v685_v40 = vld [vmem:[%s1953_s24 + $0x40] sm:$0xff] }
  0x52   : > { %700 = vperm.xlu0 %1663, %v678_v28   ;;  %v464_v41 = vld [vmem:[%s1948_s11 + $0x40] sm:$0xff]  ;;  %v686_v42 = vld [vmem:[%s1953_s24 + $0x48] sm:$0xff]  ;;  %v687_v44 = vld [vmem:[%s1953_s24 + $0x50] sm:$0xff] }
  0x53   : > { %1522 = vmatpush3.bf16.msra.mxu0 %v1519_v24  ;;  %v465_v43 = vld [vmem:[%s1948_s11 + $0x48] sm:$0xff]  ;;  %v466_v45 = vld [vmem:[%s1948_s11 + $0x50] sm:$0xff]  ;;  %v688_v46 = vld [vmem:[%s1953_s24 + $0x58] sm:$0xff] }
  0x54   : > { %v467_v47 = vld [vmem:[%s1948_s11 + $0x58] sm:$0xff]  ;;  %v689_v48 = vld [vmem:[%s1953_s24 + $0x60] sm:$0xff]  ;;  %v690_v50 = vld [vmem:[%s1953_s24 + $0x68] sm:$0xff] }
  0x55   : > { %720 = vperm.xlu1 %1664, %v682_v34   ;;  %v468_v49 = vld [vmem:[%s1948_s11 + $0x60] sm:$0xff]  ;;  %v469_v51 = vld [vmem:[%s1948_s11 + $0x68] sm:$0xff]  ;;  %v691_v52 = vld [vmem:[%s1953_s24 + $0x70] sm:$0xff] }
  0x56   : > { %1436 = vmatmul.mubr.msk.f32.vlgmr.msra.gmra.mrb[0].mxu0 %vm483_vm0, %v457_v27  ;;  %715 = vperm.xlu0 %1663, %v681_v32   ;;  %v470_v53 = vld [vmem:[%s1948_s11 + $0x70] sm:$0xff]  ;;  %v692_v54 = vld [vmem:[%s1953_s24 + $0x78] sm:$0xff]  ;;  %v2030_v58 = vld [vmem:[%s1960_s25] sm:$0xff]  }
  0x57   : > { %1438 = vmatprep.mubr.msk.f32.mxu0 %vm483_vm0, %v458_v29  ;;  %v471_v55 = vld [vmem:[%s1948_s11 + $0x78] sm:$0xff]  ;;  %v1338_v59 = vunpack.c.l.bf16 %v2030_v58  ;;  %v2036_v0 = vld [vmem:[%s2166_s2] ss:$0 sm:$0xff] }
  0x58   : > { %v2026_v56 = vld [vmem:[%s1960_s25 + $0x18] sm:$0xff]  }
  0x59   : > { %730 = vperm.xlu1 %1664, %v684_v38   ;;  %v1350_v57 = vunpack.c.l.bf16 %v2026_v56 }
  0x5a   : > { %1439 = vmatmul.mubr.msk.f32.gmra.mrb[2].mxu0 %vm483_vm0, %v459_v31  ;;  %725 = vperm.xlu0 %1663, %v683_v36  }
  0x5b   : > { %1441 = vmatprep.mubr.msk.f32.mxu0 %vm483_vm0, %v460_v33  ;;  %1500 = vmatprep.mubr.f32.mxu1 %v1350_v57 }
  0x5d   : > { %740 = vperm.xlu1 %1664, %v686_v42  }
  0x5e   : > { %1442 = vmatmul.mubr.msk.f32.gmra.mrb[4].mxu0 %vm483_vm0, %v461_v35  ;;  %735 = vperm.xlu0 %1663, %v685_v40  }
  0x5f   : > { %1444 = vmatprep.mubr.msk.f32.mxu0 %vm483_vm0, %v462_v37 }
  0x61   : > { %750 = vperm.xlu1 %1664, %v688_v46  }
  0x62   : > { %1445 = vmatmul.mubr.msk.f32.gmra.mrb[6].mxu0 %vm483_vm0, %v463_v39  ;;  %745 = vperm.xlu0 %1663, %v687_v44  }
  0x63   : > { %1447 = vmatprep.mubr.msk.f32.mxu0 %vm483_vm0, %v464_v41 }
  0x65   : > { %760 = vperm.xlu1 %1664, %v690_v50  }
  0x66   : > { %1448 = vmatmul.mubr.msk.f32.gmra.mrb[8].mxu0 %vm483_vm0, %v465_v43  ;;  %755 = vperm.xlu0 %1663, %v689_v48  }
  0x67   : > { %1450 = vmatprep.mubr.msk.f32.mxu0 %vm483_vm0, %v466_v45 }
  0x69   : > { %770 = vperm.xlu1 %1664, %v692_v54  }
  0x6a   : > { %1451 = vmatmul.mubr.msk.f32.gmra.mrb[10].mxu0 %vm483_vm0, %v467_v47  ;;  %765 = vperm.xlu0 %1663, %v691_v52  }
  0x6b   : > { %1453 = vmatprep.mubr.msk.f32.mxu0 %vm483_vm0, %v468_v49 }
  0x6e   : > { %1454 = vmatmul.mubr.msk.f32.gmra.mrb[12].mxu0 %vm483_vm0, %v469_v51 }
  0x6f   : > { %1456 = vmatprep.mubr.msk.f32.mxu0 %vm483_vm0, %v470_v53 }
  0x72   : > { %1457 = vmatmul.mubr.msk.f32.gmra.mrb[14].mxu0 %vm483_vm0, %v471_v55 }
  0x73   : > { %1491 = vmatprep.mubr.f32.mxu0 %v1338_v59 }
  0xcc   : > { %v706_v60 = vpop.permute.xlu1 %705 }
  0xcd   : > { %v696_v61 = vpop.permute.xlu0 %695 }
  0xd0   : > { %v711_v62 = vpop.permute.xlu1 %710 }
  0xd1   : > { %v701_v63 = vpop.permute.xlu0 %700 }
  0xd4   : > { %v721_v1 = vpop.permute.xlu1 %720 }
  0xd5   : > { %v716_v3 = vpop.permute.xlu0 %715 }
  0xd8   : > { %v731_v12 = vpop.permute.xlu1 %730 }
  0xd9   : > { %v726_v15 = vpop.permute.xlu0 %725 }
  0xdc   : > { %v741_v24 = vpop.permute.xlu1 %740 }
  0xdd   : > { %v736_v27 = vpop.permute.xlu0 %735 }
  0xe0   : > { %v751_v37 = vpop.permute.xlu1 %750 }
  0xe1   : > { %v746_v40 = vpop.permute.xlu0 %745 }
  0xe4   : > { %v761_v49 = vpop.permute.xlu1 %760 }
  0xe5   : > { %v756_v52 = vpop.permute.xlu0 %755 }
 0x129   : > { %v1437_v2 = vpop.f32.mrb[0].mxu0 }
 0x12a   : > { %v604_v4 = vadd.f32 %v1437_v2, %v2036_v0  ;;  %v598_v5 = vpop.f32.mrb[1].mxu0 }
 0x12b   : > { %v599_v6 = vadd.f32 %v2036_v0, %v598_v5 }
 0x12c   : > { %v774_v7 = vmul.f32 %v701_v63, %v604_v4  ;;  %v766_v4 = vpop.permute.xlu0 %765 }
 0x12d   : > { %v773_v8 = vmul.f32 %v696_v61, %v599_v6  ;;  %v1440_v9 = vpop.f32.mrb[2].mxu0 }
 0x12e   : > { %v614_v10 = vadd.f32 %v1440_v9, %v2036_v0  ;;  %v608_v11 = vpop.f32.mrb[3].mxu0  ;;  %v1368_v9 = vld [vmem:[%s1960_s25 + $0x8] sm:$0xff]  }
 0x12f   : > { %v1523_v13 = vpack.c.bf16 %v774_v7, %v773_v8  ;;  %v609_v14 = vadd.f32 %v2036_v0, %v608_v11  ;;  %v1371_v8 = vld [vmem:[%s1960_s25 + $0x20] sm:$0xff]   ;;  %v1339_v11 = vunpack.c.h.bf16 %v2030_v58 }
 0x130   : > { %v776_v16 = vmul.f32 %v711_v62, %v614_v10  ;;  %v1351_v10 = vunpack.c.h.bf16 %v2026_v56 }
 0x131   : > { %v775_v17 = vmul.f32 %v706_v60, %v609_v14  ;;  %v1443_v18 = vpop.f32.mrb[4].mxu0  ;;  %1524 = vmatprep.subr.bf16.mxu0 %v1523_v13  ;;  %1555 = vmatprep.subr.bf16.mxu1 %v1523_v13  ;;  %v1369_v14 = vld [vmem:[%s1960_s25 + $0x10] sm:$0xff]  }
 0x132   : > { %v624_v19 = vadd.f32 %v1443_v18, %v2036_v0  ;;  %v618_v20 = vpop.f32.mrb[5].mxu0  ;;  %1526 = vmatpush3.bf16.msra.mxu0 %v1523_v13  ;;  %1563 = vmatpush3.bf16.msra.mxu1 %v1523_v13  ;;  %v1372_v13 = vld [vmem:[%s1960_s25 + $0x28] sm:$0xff]   ;;  %v1346_v18 = vunpack.c.l.bf16 %v1369_v14  ;;  %v1347_v58 = vunpack.c.h.bf16 %v1369_v14  ;;  %v1021_v14 = vld [vmem:[%s1958_s20 + $0x18] sm:$0xff] (!%p1328_p6) }
 0x133   : > { %v1527_v21 = vpack.c.bf16 %v776_v16, %v775_v17  ;;  %v619_v22 = vadd.f32 %v2036_v0, %v618_v20  ;;  %v1343_v16 = vunpack.c.h.bf16 %v1368_v9  ;;  %v1358_v17 = vunpack.c.l.bf16 %v1372_v13 }
 0x134   : > { %v778_v23 = vmul.f32 %v721_v1, %v624_v19  ;;  %v771_v1 = vpop.permute.xlu1 %770  ;;  %v1373_v19 = vld [vmem:[%s1960_s25 + $0x30] sm:$0xff]   ;;  %v1359_v56 = vunpack.c.h.bf16 %v1372_v13  ;;  %v1781_v13 = vmov (!%p1328_p6), 0  }
 0x135   : > { %v777_v25 = vmul.f32 %v716_v3, %v619_v22  ;;  %v1446_v26 = vpop.f32.mrb[6].mxu0  ;;  %1528 = vmatprep.subr.bf16.mxu0 %v1527_v21  ;;  %1556 = vmatprep.subr.bf16.mxu1 %v1527_v21  ;;  %v1362_v20 = vunpack.c.l.bf16 %v1373_v19  ;;  %v1363_v22 = vunpack.c.h.bf16 %v1373_v19  ;;  %v1024_v19 = vld [vmem:[%s1958_s20 + $0x30] sm:$0xff] (!%p1328_p6) }
 0x136   : > { %v634_v28 = vadd.f32 %v1446_v26, %v2036_v0  ;;  %v628_v29 = vpop.f32.mrb[7].mxu0  ;;  %1530 = vmatpush3.bf16.msra.mxu0 %v1527_v21  ;;  %1564 = vmatpush3.bf16.msra.mxu1 %v1527_v21  ;;  %v1374_v21 = vld [vmem:[%s1960_s25 + $0x38] sm:$0xff]   ;;  %v790_v26 = vld [vmem:[#allocation2 + $0x8] sm:$0xff] }
 0x137   : > { %v1531_v30 = vpack.c.bf16 %v778_v23, %v777_v25  ;;  %v629_v31 = vadd.f32 %v2036_v0, %v628_v29  ;;  %v1366_v23 = vunpack.c.l.bf16 %v1374_v21  ;;  %v796_v25 = vld [vmem:[#allocation2 + $0x38] sm:$0xff]  ;;  %1666 = vset.pattern.permute.xlu1 (!%p1328_p6), %v1781_v13  ;;  %1665 = vset.pattern.permute.xlu0 (!%p1328_p6), %v1781_v13 }
 0x138   : > { %v780_v32 = vmul.f32 %v731_v12, %v634_v28  ;;  %v1342_v12 = vunpack.c.l.bf16 %v1368_v9  ;;  %v789_v28 = vld [vmem:[#allocation2] sm:$0xff] }
 0x139   : > { %v779_v33 = vmul.f32 %v726_v15, %v629_v31  ;;  %v1449_v34 = vpop.f32.mrb[8].mxu0  ;;  %1532 = vmatprep.subr.bf16.mxu0 %v1531_v30  ;;  %1557 = vmatprep.subr.bf16.mxu1 %v1531_v30  ;;  %v1355_v15 = vunpack.c.h.bf16 %v1371_v8 }
 0x13a   : > { %v644_v35 = vadd.f32 %v1449_v34, %v2036_v0  ;;  %v638_v36 = vpop.f32.mrb[9].mxu0  ;;  %1534 = vmatpush3.bf16.msra.mxu0 %v1531_v30  ;;  %1565 = vmatpush3.bf16.msra.mxu1 %v1531_v30 }
 0x13b   : > { %v1535_v38 = vpack.c.bf16 %v780_v32, %v779_v33  ;;  %v639_v39 = vadd.f32 %v2036_v0, %v638_v36  ;;  %v798_v36 = vld [vmem:[#allocation2 + $0x48] sm:$0xff] }
 0x13c   : > { %v782_v41 = vmul.f32 %v741_v24, %v644_v35  ;;  %v1367_v24 = vunpack.c.h.bf16 %v1374_v21  ;;  %v1028_v21 = vld [vmem:[%s1958_s20 + $0x50] sm:$0xff] (!%p1328_p6) }
 0x13d   : > { %v781_v42 = vmul.f32 %v736_v27, %v639_v39  ;;  %v1452_v43 = vpop.f32.mrb[10].mxu0  ;;  %1536 = vmatprep.subr.bf16.mxu0 %v1535_v38  ;;  %1558 = vmatprep.subr.bf16.mxu1 %v1535_v38  ;;  %v795_v27 = vld [vmem:[#allocation2 + $0x30] sm:$0xff]  ;;  %v797_v39 = vld [vmem:[#allocation2 + $0x40] sm:$0xff] }
 0x13e   : > { %v654_v44 = vadd.f32 %v1452_v43, %v2036_v0  ;;  %v648_v45 = vpop.f32.mrb[11].mxu0  ;;  %1538 = vmatpush3.bf16.msra.mxu0 %v1535_v38  ;;  %1566 = vmatpush3.bf16.msra.mxu1 %v1535_v38  ;;  %v792_v38 = vld [vmem:[#allocation2 + $0x18] sm:$0xff] }
 0x13f   : > { %v1539_v46 = vpack.c.bf16 %v782_v41, %v781_v42  ;;  %v649_v47 = vadd.f32 %v2036_v0, %v648_v45 }
 0x140   : > { %v784_v48 = vmul.f32 %v751_v37, %v654_v44 }
 0x141   : > { %v783_v50 = vmul.f32 %v746_v40, %v649_v47  ;;  %v1455_v51 = vpop.f32.mrb[12].mxu0  ;;  %1540 = vmatprep.subr.bf16.mxu0 %v1539_v46  ;;  %1559 = vmatprep.subr.bf16.mxu1 %v1539_v46  ;;  %v791_v40 = vld [vmem:[#allocation2 + $0x10] sm:$0xff] }
 0x142   : > { %v664_v53 = vadd.f32 %v1455_v51, %v2036_v0  ;;  %v658_v54 = vpop.f32.mrb[13].mxu0  ;;  %1542 = vmatpush3.bf16.msra.mxu0 %v1539_v46  ;;  %1567 = vmatpush3.bf16.msra.mxu1 %v1539_v46  ;;  %v799_v51 = vld [vmem:[#allocation2 + $0x50] sm:$0xff] }
 0x143   : > { %v1543_v55 = vpack.c.bf16 %v784_v48, %v783_v50  ;;  %v659_v57 = vadd.f32 %v2036_v0, %v658_v54  ;;  %v800_v48 = vld [vmem:[#allocation2 + $0x58] sm:$0xff]  ;;  %v794_v50 = vld [vmem:[#allocation2 + $0x28] sm:$0xff] }
 0x144   : > { %v786_v59 = vmul.f32 %v761_v49, %v664_v53 }
 0x145   : > { %v785_v60 = vmul.f32 %v756_v52, %v659_v57  ;;  %v1458_v61 = vpop.f32.mrb[14].mxu0  ;;  %1544 = vmatprep.subr.bf16.mxu0 %v1543_v55  ;;  %1560 = vmatprep.subr.bf16.mxu1 %v1543_v55  ;;  %v793_v52 = vld [vmem:[#allocation2 + $0x20] sm:$0xff] }
 0x146   : > { %v674_v62 = vadd.f32 %v1458_v61, %v2036_v0  ;;  %v668_v63 = vpop.f32.mrb[15].mxu0  ;;  %1546 = vmatpush3.bf16.msra.mxu0 %v1543_v55  ;;  %1568 = vmatpush3.bf16.msra.mxu1 %v1543_v55 }
 0x147   : > { %v1547_v2 = vpack.c.bf16 %v786_v59, %v785_v60  ;;  %v669_v3 = vadd.f32 %v2036_v0, %v668_v63  ;;  %v1354_v0 = vunpack.c.l.bf16 %v1371_v8 }
 0x148   : > { %v788_v5 = vmul.f32 %v771_v1, %v674_v62  ;;  %v802_v62 = vld [vmem:[#allocation2 + $0x68] sm:$0xff]  ;;  %v801_v1 = vld [vmem:[#allocation2 + $0x60] sm:$0xff] }
 0x149   : > { %v787_v6 = vmul.f32 %v766_v4, %v669_v3  ;;  %1548 = vmatprep.subr.bf16.mxu0 %v1547_v2  ;;  %1561 = vmatprep.subr.bf16.mxu1 %v1547_v2 }
 0x14a   : > { %1550 = vmatpush3.bf16.msra.mxu0 %v1547_v2  ;;  %1569 = vmatpush3.bf16.msra.mxu1 %v1547_v2 }
 0x14b   : > { %v1551_v7 = vpack.c.bf16 %v788_v5, %v787_v6  ;;  %v804_v6 = vld [vmem:[#allocation2 + $0x78] sm:$0xff] }
 0x14d   : > { %1552 = vmatprep.subr.bf16.mxu0 %v1551_v7  ;;  %1562 = vmatprep.subr.bf16.mxu1 %v1551_v7 }
 0x14e   : > { %1554 = vmatpush3.bf16.msra.mxu0 %v1551_v7  ;;  %1570 = vmatpush3.bf16.msra.mxu1 %v1551_v7  ;;  %v803_v7 = vld [vmem:[#allocation2 + $0x70] sm:$0xff] }
 0x151   : > { %1501 = vmatmul.mubr.f32.vlgmr.msra.gmra.mrb[0].mxu1 %v1351_v10  ;;  %1492 = vmatmul.mubr.f32.vlgmr.msra.gmra.mrb[16].mxu0 %v1339_v11 }
 0x152   : > { %1503 = vmatprep.mubr.f32.mxu1 %v1354_v0  ;;  %1494 = vmatprep.mubr.f32.mxu0 %v1342_v12  ;;  %v1020_v0 = vld [vmem:[%s1958_s20 + $0x10] sm:$0xff] (!%p1328_p6)  ;;  %v1018_v12 = vld [vmem:[%s1958_s20] sm:$0xff] (!%p1328_p6) }
 0x153   : > { %1062 = vperm.xlu1 (!%p1328_p6), %1666, %v1020_v0   ;;  %1052 = vperm.xlu0 (!%p1328_p6), %1665, %v1018_v12  }
 0x155   : > { %1504 = vmatmul.mubr.f32.gmra.mrb[2].mxu1 %v1355_v15  ;;  %1495 = vmatmul.mubr.f32.gmra.mrb[18].mxu0 %v1343_v16  ;;  %v1019_v15 = vld [vmem:[%s1958_s20 + $0x8] sm:$0xff] (!%p1328_p6) }
 0x156   : > { %1506 = vmatprep.mubr.f32.mxu1 %v1358_v17  ;;  %1497 = vmatprep.mubr.f32.mxu0 %v1346_v18  ;;  %v1023_v16 = vld [vmem:[%s1958_s20 + $0x28] sm:$0xff] (!%p1328_p6)  ;;  %v1022_v17 = vld [vmem:[%s1958_s20 + $0x20] sm:$0xff] (!%p1328_p6)  ;;  %v1025_v18 = vld [vmem:[%s1958_s20 + $0x38] sm:$0xff] (!%p1328_p6) }
 0x157   : > { %1067 = vperm.xlu1 (!%p1328_p6), %1666, %v1021_v14   ;;  %1057 = vperm.xlu0 (!%p1328_p6), %1665, %v1019_v15  }
 0x159   : > { %1507 = vmatmul.mubr.f32.gmra.mrb[4].mxu1 %v1359_v56  ;;  %1498 = vmatmul.mubr.f32.gmra.mrb[20].mxu0 %v1347_v58  ;;  %v1027_v56 = vld [vmem:[%s1958_s20 + $0x48] sm:$0xff] (!%p1328_p6)  ;;  %v1026_v58 = vld [vmem:[%s1958_s20 + $0x40] sm:$0xff] (!%p1328_p6) }
 0x15a   : > { %1509 = vmatprep.mubr.f32.mxu1 %v1362_v20  ;;  %v1029_v20 = vld [vmem:[%s1958_s20 + $0x58] sm:$0xff] (!%p1328_p6) }
 0x15b   : > { %1077 = vperm.xlu1 (!%p1328_p6), %1666, %v1023_v16   ;;  %1072 = vperm.xlu0 (!%p1328_p6), %1665, %v1022_v17  }
 0x15d   : > { %1510 = vmatmul.mubr.f32.gmra.mrb[6].mxu1 %v1363_v22  ;;  %v1031_v22 = vld [vmem:[%s1958_s20 + $0x68] sm:$0xff] (!%p1328_p6) }
 0x15e   : > { %1512 = vmatprep.mubr.f32.mxu1 %v1366_v23  ;;  %v1030_v23 = vld [vmem:[%s1958_s20 + $0x60] sm:$0xff] (!%p1328_p6) }
 0x15f   : > { %1087 = vperm.xlu1 (!%p1328_p6), %1666, %v1025_v18   ;;  %1082 = vperm.xlu0 (!%p1328_p6), %1665, %v1024_v19  }
 0x161   : > { %1513 = vmatmul.mubr.f32.gmra.mrb[8].mxu1 %v1367_v24  ;;  %v1033_v24 = vld [vmem:[%s1958_s20 + $0x78] sm:$0xff] (!%p1328_p6) }
 0x163   : > { %1097 = vperm.xlu1 (!%p1328_p6), %1666, %v1027_v56   ;;  %1092 = vperm.xlu0 (!%p1328_p6), %1665, %v1026_v58  }
 0x167   : > { %1107 = vperm.xlu1 (!%p1328_p6), %1666, %v1029_v20   ;;  %1102 = vperm.xlu0 (!%p1328_p6), %1665, %v1028_v21  }
 0x16b   : > { %1117 = vperm.xlu1 (!%p1328_p6), %1666, %v1031_v22   ;;  %1112 = vperm.xlu0 (!%p1328_p6), %1665, %v1030_v23  }
 0x16f   : > { %1127 = vperm.xlu1 (!%p1328_p6), %1666, %v1033_v24  }
 0x224   : > { %v1502_v29 = vpop.f32.mrb[0].mxu1  ;;  %v1493_v30 = vpop.f32.mrb[16].mxu0 }
 0x225   : > { %v989_v31 = vadd.f32 %v1502_v29, %v796_v25  ;;  %v933_v32 = vpop.f32.mrb[1].mxu1  ;;  %v983_v33 = vadd.f32 %v1493_v30, %v790_v26  ;;  %v903_v34 = vpop.f32.mrb[17].mxu0  ;;  %v1032_v25 = vld [vmem:[%s1958_s20 + $0x70] sm:$0xff] (!%p1328_p6) }
 0x226   : > { %v988_v35 = vadd.f32 %v933_v32, %v795_v27  ;;  %v982_v37 = vadd.f32 %v903_v34, %v789_v28  ;;  %1122 = vperm.xlu0 (!%p1328_p6), %1665, %v1032_v25   ;;  %v1063_v28 = vpop.permute.xlu1 (!%p1328_p6), %1062  ;;  %v1053_v29 = vpop.permute.xlu0 (!%p1328_p6), %1052 }
 0x227   : > { %1005 = vst [vmem:[#allocation2 + $0x38] sm:$0xff] %v989_v31  ;;  %999 = vst [vmem:[#allocation2 + $0x8] sm:$0xff] %v983_v33 }
 0x228   : > { %1004 = vst [vmem:[#allocation2 + $0x30] sm:$0xff] %v988_v35  ;;  %v1505_v41 = vpop.f32.mrb[2].mxu1  ;;  %998 = vst [vmem:[#allocation2] sm:$0xff] %v982_v37  ;;  %v1496_v42 = vpop.f32.mrb[18].mxu0 }
 0x229   : > { %v991_v43 = vadd.f32 %v1505_v41, %v798_v36  ;;  %v943_v44 = vpop.f32.mrb[3].mxu1  ;;  %v985_v45 = vadd.f32 %v1496_v42, %v792_v38  ;;  %v913_v46 = vpop.f32.mrb[19].mxu0 }
 0x22a   : > { %v990_v47 = vadd.f32 %v943_v44, %v797_v39  ;;  %v984_v49 = vadd.f32 %v913_v46, %v791_v40  ;;  %v1068_v34 = vpop.permute.xlu1 (!%p1328_p6), %1067  ;;  %v1058_v35 = vpop.permute.xlu0 (!%p1328_p6), %1057 }
 0x22b   : > { %1007 = vst [vmem:[#allocation2 + $0x48] sm:$0xff] %v991_v43  ;;  %1001 = vst [vmem:[#allocation2 + $0x18] sm:$0xff] %v985_v45 }
 0x22c   : > { %1006 = vst [vmem:[#allocation2 + $0x40] sm:$0xff] %v990_v47  ;;  %v1508_v53 = vpop.f32.mrb[4].mxu1  ;;  %1000 = vst [vmem:[#allocation2 + $0x10] sm:$0xff] %v984_v49  ;;  %v1499_v54 = vpop.f32.mrb[20].mxu0 }
 0x22d   : > { %v993_v55 = vadd.f32 %v1508_v53, %v800_v48  ;;  %v953_v57 = vpop.f32.mrb[5].mxu1  ;;  %v987_v59 = vadd.f32 %v1499_v54, %v794_v50  ;;  %v923_v60 = vpop.f32.mrb[21].mxu0 }
 0x22e   : > { %v992_v61 = vadd.f32 %v953_v57, %v799_v51  ;;  %v986_v63 = vadd.f32 %v923_v60, %v793_v52  ;;  %v1035_v33 = vld [vmem:[#allocation2 + $0x8] sm:$0xff] (!%p1328_p6)  ;;  %v1078_v40 = vpop.permute.xlu1 (!%p1328_p6), %1077  ;;  %v1073_v41 = vpop.permute.xlu0 (!%p1328_p6), %1072  ;;  %v1041_v44 = vld [vmem:[#allocation2 + $0x38] sm:$0xff] (!%p1328_p6) }
 0x22f   : > { %1009 = vst [vmem:[#allocation2 + $0x58] sm:$0xff] %v993_v55  ;;  %1003 = vst [vmem:[#allocation2 + $0x28] sm:$0xff] %v987_v59  ;;  %v1034_v27 = vld [vmem:[#allocation2] sm:$0xff] (!%p1328_p6)  ;;  %v1131_v37 = vmul.f32 (!%p1328_p6), %v1058_v35, %v1035_v33  ;;  %v1040_v45 = vld [vmem:[#allocation2 + $0x30] sm:$0xff] (!%p1328_p6) }
 0x230   : > { %1008 = vst [vmem:[#allocation2 + $0x50] sm:$0xff] %v992_v61  ;;  %v1511_v2 = vpop.f32.mrb[6].mxu1  ;;  %1002 = vst [vmem:[#allocation2 + $0x20] sm:$0xff] %v986_v63  ;;  %v1130_v31 = vmul.f32 (!%p1328_p6), %v1053_v29, %v1034_v27 }
 0x231   : > { %v995_v3 = vadd.f32 %v1511_v2, %v802_v62  ;;  %v963_v4 = vpop.f32.mrb[7].mxu1  ;;  %1147 = vst [vmem:[%s1962_s19 + $0x8] sm:$0xff] (!%p1328_p6), %v1131_v37 }
 0x232   : > { %v994_v5 = vadd.f32 %v963_v4, %v801_v1  ;;  %1017 = sbr.rel (%p1328_p6) target bundleno = 681 (0x2a9), region = 93  ;;  %v1037_v32 = vld [vmem:[#allocation2 + $0x18] sm:$0xff] (!%p1328_p6)  ;;  %1146 = vst [vmem:[%s1962_s19] sm:$0xff] (!%p1328_p6), %v1130_v31  ;;  %v1088_v46 = vpop.permute.xlu1 (!%p1328_p6), %1087  ;;  %v1083_v47 = vpop.permute.xlu0 (!%p1328_p6), %1082  ;;  %v1043_v50 = vld [vmem:[#allocation2 + $0x48] sm:$0xff] (!%p1328_p6) }
 0x233   : > { %1011 = vst [vmem:[#allocation2 + $0x68] sm:$0xff] %v995_v3  ;;  %v1036_v26 = vld [vmem:[#allocation2 + $0x10] sm:$0xff] (!%p1328_p6)  ;;  %v1133_v36 = vmul.f32 (!%p1328_p6), %v1068_v34, %v1037_v32  ;;  %v1137_v48 = vmul.f32 (!%p1328_p6), %v1088_v46, %v1041_v44  ;;  %v1136_v49 = vmul.f32 (!%p1328_p6), %v1083_v47, %v1040_v45  ;;  %v1042_v51 = vld [vmem:[#allocation2 + $0x40] sm:$0xff] (!%p1328_p6) }
 0x234   : > { %1010 = vst [vmem:[#allocation2 + $0x60] sm:$0xff] %v994_v5  ;;  %v1514_v8 = vpop.f32.mrb[8].mxu1  ;;  %v1132_v30 = vmul.f32 (!%p1328_p6), %v1063_v28, %v1036_v26 }
 0x235   : > { %v997_v9 = vadd.f32 %v1514_v8, %v804_v6  ;;  %v973_v10 = vpop.f32.mrb[9].mxu1  ;;  %1149 = vst [vmem:[%s1962_s19 + $0x18] sm:$0xff] (!%p1328_p6), %v1133_v36  ;;  %1153 = vst [vmem:[%s1962_s19 + $0x38] sm:$0xff] (!%p1328_p6), %v1137_v48 }
 0x236   : > { %v996_v11 = vadd.f32 %v973_v10, %v803_v7  ;;  %1148 = vst [vmem:[%s1962_s19 + $0x10] sm:$0xff] (!%p1328_p6), %v1132_v30  ;;  %v1039_v38 = vld [vmem:[#allocation2 + $0x28] sm:$0xff] (!%p1328_p6)  ;;  %1152 = vst [vmem:[%s1962_s19 + $0x30] sm:$0xff] (!%p1328_p6), %v1136_v49  ;;  %v1098_v52 = vpop.permute.xlu1 (!%p1328_p6), %1097  ;;  %v1093_v53 = vpop.permute.xlu0 (!%p1328_p6), %1092  ;;  %v1045_v57 = vld [vmem:[#allocation2 + $0x58] sm:$0xff] (!%p1328_p6) }
 0x237   : > { %1013 = vst [vmem:[#allocation2 + $0x78] sm:$0xff] %v997_v9  ;;  %v1038_v39 = vld [vmem:[#allocation2 + $0x20] sm:$0xff] (!%p1328_p6)  ;;  %v1135_v42 = vmul.f32 (!%p1328_p6), %v1078_v40, %v1039_v38  ;;  %v1139_v54 = vmul.f32 (!%p1328_p6), %v1098_v52, %v1043_v50  ;;  %v1138_v55 = vmul.f32 (!%p1328_p6), %v1093_v53, %v1042_v51  ;;  %v1044_v59 = vld [vmem:[#allocation2 + $0x50] sm:$0xff] (!%p1328_p6) }
 0x238   : > { %1012 = vst [vmem:[#allocation2 + $0x70] sm:$0xff] %v996_v11  ;;  %v1134_v43 = vmul.f32 (!%p1328_p6), %v1073_v41, %v1038_v39 }
 0x239   : > { %1151 = vst [vmem:[%s1962_s19 + $0x28] sm:$0xff] %v1135_v42  ;;  %1155 = vst [vmem:[%s1962_s19 + $0x48] sm:$0xff] %v1139_v54 }
 0x23a   : > { %1150 = vst [vmem:[%s1962_s19 + $0x20] sm:$0xff] %v1134_v43  ;;  %1154 = vst [vmem:[%s1962_s19 + $0x40] sm:$0xff] %v1138_v55  ;;  %v1108_v60 = vpop.permute.xlu1 %1107  ;;  %v1103_v61 = vpop.permute.xlu0 %1102  ;;  %v1047_v1 = vld [vmem:[#allocation2 + $0x68] sm:$0xff] }
 0x23b   : > { %v1141_v62 = vmul.f32 %v1108_v60, %v1045_v57  ;;  %v1140_v63 = vmul.f32 %v1103_v61, %v1044_v59  ;;  %v1046_v2 = vld [vmem:[#allocation2 + $0x60] sm:$0xff] }
 0x23d   : > { %1157 = vst [vmem:[%s1962_s19 + $0x58] sm:$0xff] %v1141_v62  ;;  %1156 = vst [vmem:[%s1962_s19 + $0x50] sm:$0xff] %v1140_v63 }
 0x23e   : > { %v1118_v3 = vpop.permute.xlu1 %1117  ;;  %v1113_v4 = vpop.permute.xlu0 %1112  ;;  %v1049_v7 = vld [vmem:[#allocation2 + $0x78] sm:$0xff] }
 0x23f   : > { %v1143_v5 = vmul.f32 %v1118_v3, %v1047_v1  ;;  %v1142_v6 = vmul.f32 %v1113_v4, %v1046_v2  ;;  %v1048_v8 = vld [vmem:[#allocation2 + $0x70] sm:$0xff] }
 0x241   : > { %1159 = vst [vmem:[%s1962_s19 + $0x68] sm:$0xff] %v1143_v5  ;;  %1158 = vst [vmem:[%s1962_s19 + $0x60] sm:$0xff] %v1142_v6 }
 0x242   : > { %v1128_v9 = vpop.permute.xlu1 %1127 }
 0x243   : > { %v1145_v11 = vmul.f32 %v1128_v9, %v1049_v7 }
 0x245   : > { %1161 = vst [vmem:[%s1962_s19 + $0x78] sm:$0xff] %v1145_v11 }
 0x2a5   : > { %v1123_v10 = vpop.permute.xlu0 %1122 }
 0x2a6   : > { %v1144_v0 = vmul.f32 %v1123_v10, %v1048_v8 }
 0x2a8   : > { %1160 = vst [vmem:[%s1962_s19 + $0x70] sm:$0xff] %v1144_v0 }
 0x2a9 PF: > { %s1335_s25 = sshll.u32 %s1765_s27, 11  ;;  %s1176_s11 = sshll.u32 %s1962_s19, 4  ;;  %s2102_s11 = int_to_ptr.vmem [resolvable:$true] %s1176_s11 }
 0x2aa   : > { %s2099_s14 = scalar_lea.hbm %s2170_s6, %s1335_s25  ;;  %s2189_s24 = sand.u32 1, %s1745_s22  }
 0x2ab   : > { %s2106_s9 = scalar_lea.sflag [#allocation5], %s2189_s24  ;;  %s1667_s5 = scalar_lea.vmem %s2102_s11, 2048 }
 0x2ac   : > { %p1668_p8 = scmp.ne.s32.totalorder %s2102_s11, %s1667_s5  ;;  %s1782_s27 = smov [#allocation4]  }
 0x2ad   : > { %s1671_s28 = sshll.u32 %s1782_s27, 4  ;;  %s1672_s28 = int_to_ptr.vmem [resolvable:$false] %s1671_s28 }
 0x2ae   : > { %p1669_p9 = pnand %p1668_p8, %p1892_p7  ;;  %s1673_s29 = scalar_lea.vmem %s1672_s28, 4096 }
 0x2af   : > { %p1674_p11 = scmp.lt.s32.totalorder %s2102_s11, %s1672_s28  ;;  %p1675_p13 = scmp.lt.s32.totalorder %s1673_s29, %s1667_s5 }
 0x2b0   : > { %p1670_p10 = pneg %p1669_p9 }
 0x2b1   : > { %p1676_p0 = por %p1675_p13, %p1674_p11 }
 0x2b3   : > { %p1677_p1 = pnand %p1676_p0, %p1670_p10 }
 0x2b5   : > { %1680 = shalt.err (!%p1677_p1)
}
 0x2b6   : > { %s1681_s19 = scalar_lea.hbm %s2099_s14, 2048  ;;  %s1685_s7 = scalar_lea.hbm %s2170_s6, 4096 }
 0x2b7   : > { %p1682_p2 = scmp.ne.s32.totalorder %s2099_s14, %s1681_s19  ;;  %p1686_p5 = scmp.lt.u32.totalorder %s2099_s14, %s2170_s6 }
 0x2b8   : > { %p1687_p6 = scmp.lt.u32.totalorder %s1685_s7, %s1681_s19  ;;  %p1689_p9 = scmp.lt.u32.totalorder %s1681_s19, %s2099_s14 }
 0x2b9   : > { %p1683_p3 = pnand %p1682_p2, %p1892_p7 }
 0x2ba   : > { %p1688_p8 = por %p1687_p6, %p1686_p5 }
 0x2bb   : > { %p1684_p4 = pneg %p1683_p3 }
 0x2bc   : > { %p1690_p10 = por %p1689_p9, %p1688_p8 }
 0x2be   : > { %p1691_p11 = pnand %p1690_p10, %p1684_p4 }
 0x2c0   : > { %1694 = shalt.err (!%p1691_p11)
}
 0x2c1   : > { %s1783_s16 = smov 128   ;;  %s1784_s17 = smov 8  }
 0x2c2   : > { %1571 = dma.vmem_to_hbm [thread:$0]  (%p1892_p7), %s2102_s11, 2048, %s2099_s14, %s2106_s9, %s1783_s16, %s1783_s16, %s1784_s17  }
 0x2c3 PF: > { %p1577_p13 = scmp.ge.s32.totalorder %s1777_s30, 2  ;;  %s1191_s25 = sand.u32 1, %s1741_s21  }
 0x2c4   : > { %s1192_s26 = scalar_lea.sflag [#allocation5], %s1191_s25 }
 0x2c5   : > { %p1574_p0 = pnand %p1577_p13, %p1900_p12 }
 0x2c7   : > { %1736 = dma.done.wait (!%p1574_p0), %s1192_s26, 2048  }
 0x2c8   : > { %1738 = vsyncadd (!%p1574_p0), %s1192_s26, 4294965248  ;;  %s19_s30 = sadd.s32 1, %s1777_s30   ;;  %s2190_s20 = sld [smem:[#allocation12_spill]] }
 0x2c9   : > { %p16_p1 = scmp.ge.s32.totalorder %s19_s30, 6   ;;  %s2191_s24 = sld [smem:[#allocation7_spill]] }
 0x2ca   : > { %s2192_s25 = sld [smem:[#allocation13_spill]]  ;;  %s2193_s26 = sld [smem:[#allocation8_spill]] }
 0x2cb   : > { %s2194_s27 = sld [smem:[#allocation9_spill]]  ;;  %s2195_s28 = sld [smem:[#allocation10_spill]] }
 0x2cc   : > { %s2196_s29 = sld [smem:[#allocation11_spill]]  ;;  %s2197_s21 = smov %s1745_s22 }
 0x2cd   : > { %s2198_s22 = smov %s1749_s23  ;;  %18 = sbr.rel (!%p16_p1) target bundleno = 8 (0x8), region = 142 }
 0x2ce   : > { %s2199_s23 = smov %s2190_s20 }
 0x2d4   :  { %1197 = vsyncpa [#allocation5], 1 }
 0x2d5   :  { %1199 = vsyncpa [#allocation5 + $0x1], 1 }

</bundles_post_ra>
